<compile_context>
chip_gen: v7x
topology: tpu7x:2x2x1
jax: 0.10.0
libtpu: 0.0.40
codegen_flags: <defaults>
</compile_context>

<pallas_src>
import functools
import math

import jax
import jax.numpy as jnp
from jax.experimental import pallas as pl
from jax.experimental.pallas import tpu as pltpu


# ---------------------------------------------------------------------------
# RMSNorm
# ---------------------------------------------------------------------------
def _rmsnorm_kernel(x_ref, w_ref, o_ref, *, eps):
    x = x_ref[...].astype(jnp.float32)
    ms = jnp.mean(x * x, axis=-1, keepdims=True)
    normed = x * jax.lax.rsqrt(ms + eps)
    o_ref[...] = (normed * w_ref[...]).astype(o_ref.dtype)


def rmsnorm(x, weight, *, eps=1e-6, tm=256):
    B, S, dim = x.shape
    M = B * S
    tm = min(tm, M)
    if M % tm != 0:
        tm = M
    x2d = x.reshape(M, dim)
    w2d = weight.reshape(1, dim).astype(jnp.float32)
    out = pl.pallas_call(
        functools.partial(_rmsnorm_kernel, eps=eps),
        out_shape=jax.ShapeDtypeStruct((M, dim), x.dtype),
        grid_spec=pltpu.PrefetchScalarGridSpec(
            num_scalar_prefetch=0,
            grid=(M // tm,),
            in_specs=[
                pl.BlockSpec((tm, dim), lambda i: (i, 0)),
                pl.BlockSpec((1, dim), lambda i: (0, 0)),
            ],
            out_specs=pl.BlockSpec((tm, dim), lambda i: (i, 0)),
        ),
        compiler_params=pltpu.CompilerParams(dimension_semantics=("parallel",)),
    )(x2d, w2d)
    return out.reshape(B, S, dim)


# ---------------------------------------------------------------------------
# Linear (x @ W + b) used for the attention in/out projections
# ---------------------------------------------------------------------------
def _linear_kernel(x_ref, w_ref, b_ref, o_ref):
    acc = jnp.dot(x_ref[...], w_ref[...], preferred_element_type=jnp.float32)
    o_ref[...] = (acc + b_ref[...].astype(jnp.float32)).astype(o_ref.dtype)


def linear(x2d, w, b, *, tm=256, tn=512):
    M, K = x2d.shape
    N = w.shape[1]
    tm = min(tm, M)
    if M % tm != 0:
        tm = M
    tn = min(tn, N)
    if N % tn != 0:
        tn = N
    return pl.pallas_call(
        _linear_kernel,
        out_shape=jax.ShapeDtypeStruct((M, N), x2d.dtype),
        grid_spec=pltpu.PrefetchScalarGridSpec(
            num_scalar_prefetch=0,
            grid=(M // tm, N // tn),
            in_specs=[
                pl.BlockSpec((tm, K), lambda i, j: (i, 0)),
                pl.BlockSpec((K, tn), lambda i, j: (0, j)),
                pl.BlockSpec((1, tn), lambda i, j: (0, j)),
            ],
            out_specs=pl.BlockSpec((tm, tn), lambda i, j: (i, j)),
        ),
        compiler_params=pltpu.CompilerParams(
            dimension_semantics=("parallel", "parallel")),
    )(x2d, w, b.reshape(1, N))


# ---------------------------------------------------------------------------
# Multi-head self-attention
# ---------------------------------------------------------------------------
def _build_attn_bias(attn_mask, key_padding_mask, is_causal, B, S):
    """Combine causal / attn_mask / key_padding_mask into an additive f32 bias."""
    bias = jnp.zeros((B, S, S), jnp.float32)
    neg = jnp.asarray(-1e30, jnp.float32)
    if is_causal:
        row = jnp.arange(S)[:, None]
        col = jnp.arange(S)[None, :]
        bias = bias + jnp.where(col > row, neg, 0.0)[None, :, :]
    if attn_mask is not None:
        # TODO(synk): 3-D per-head attn_mask ([B*H, L, S]) not supported; only
        # 2-D [L, S] or [B, L, S] boolean / additive masks.
        if attn_mask.dtype == jnp.bool_:
            m = jnp.where(attn_mask, neg, 0.0)
        else:
            m = attn_mask.astype(jnp.float32)
        if m.ndim == 2:
            m = m[None]
        bias = bias + m
    if key_padding_mask is not None:  # [B, S] bool, True = ignore that key
        bias = bias + jnp.where(key_padding_mask, neg, 0.0)[:, None, :]
    return bias


def _mha_kernel(q_ref, k_ref, v_ref, bias_ref, o_ref, *, scale):
    q = q_ref[...][0, 0].astype(jnp.float32)       # [S, Dh]
    k = k_ref[...][0, 0].astype(jnp.float32)       # [S, Dh]
    v = v_ref[...][0, 0]                           # [S, Dh]
    s = jax.lax.dot_general(q, k, (((1,), (1,)), ((), ())),
                            preferred_element_type=jnp.float32) * scale
    s = s + bias_ref[...][0]
    m = jnp.max(s, axis=-1, keepdims=True)
    p = jnp.exp(s - m)
    denom = jnp.sum(p, axis=-1, keepdims=True)
    attn = p / denom
    # TODO(synk): attention-weight dropout (training mode) not implemented.
    out = jnp.dot(attn.astype(v.dtype), v, preferred_element_type=jnp.float32)
    o_ref[...] = out.reshape(o_ref.shape).astype(o_ref.dtype)


def multihead_self_attention(x, in_proj_w, in_proj_b, out_proj_w, out_proj_b,
                             n_heads, *, attn_mask=None, key_padding_mask=None,
                             is_causal=False):
    B, S, E = x.shape
    H = n_heads
    Dh = E // H
    assert H * Dh == E

    qkv = linear(x.reshape(B * S, E), in_proj_w, in_proj_b)
    qkv = qkv.reshape(B, S, 3, H, Dh)
    q = jnp.transpose(qkv[:, :, 0], (0, 2, 1, 3))  # [B, H, S, Dh]
    k = jnp.transpose(qkv[:, :, 1], (0, 2, 1, 3))
    v = jnp.transpose(qkv[:, :, 2], (0, 2, 1, 3))

    bias = _build_attn_bias(attn_mask, key_padding_mask, is_causal, B, S)
    scale = 1.0 / math.sqrt(Dh)

    # TODO(synk): full sequence per (batch, head) block; no flash-style KV
    # tiling for very long sequences.
    attn_out = pl.pallas_call(
        functools.partial(_mha_kernel, scale=scale),
        out_shape=jax.ShapeDtypeStruct((B, H, S, Dh), x.dtype),
        grid_spec=pltpu.PrefetchScalarGridSpec(
            num_scalar_prefetch=0,
            grid=(B, H),
            in_specs=[
                pl.BlockSpec((1, 1, S, Dh), lambda b, h: (b, h, 0, 0)),
                pl.BlockSpec((1, 1, S, Dh), lambda b, h: (b, h, 0, 0)),
                pl.BlockSpec((1, 1, S, Dh), lambda b, h: (b, h, 0, 0)),
                pl.BlockSpec((1, S, S), lambda b, h: (b, 0, 0)),
            ],
            out_specs=pl.BlockSpec((1, 1, S, Dh), lambda b, h: (b, h, 0, 0)),
        ),
        compiler_params=pltpu.CompilerParams(
            dimension_semantics=("parallel", "parallel")),
    )(q, k, v, bias)

    ctx = jnp.transpose(attn_out, (0, 2, 1, 3)).reshape(B * S, E)
    out = linear(ctx, out_proj_w, out_proj_b)
    return out.reshape(B, S, E)


# ---------------------------------------------------------------------------
# SwiGLU FFN (the hot path — incorporates the performance review)
# ---------------------------------------------------------------------------
def _swiglu_kernel_direct(x_ref, wug_ref, wd_ref, o_ref, *, ht):
    """f32-output path: accumulate directly into the resident output block."""
    h = pl.program_id(1)

    @pl.when(h == 0)
    def _init():
        o_ref[...] = jnp.zeros_like(o_ref)

    x = x_ref[...]
    # One fused MXU call computes both the up and gate projections for this
    # hidden tile ([tm, 2*ht] = [up | gate]).
    ug = jnp.dot(x, wug_ref[...], preferred_element_type=jnp.float32)
    up = ug[:, :ht]
    gate = ug[:, ht:]
    hidden = (up * jax.nn.sigmoid(up)) * gate           # silu in f32 (VPU/EUP)
    o_ref[...] += jnp.dot(hidden.astype(wd_ref.dtype), wd_ref[...],
                          preferred_element_type=jnp.float32)
    # TODO(synk): training-mode dropout on the FFN output not implemented
    # (identity at inference).


def _swiglu_kernel_acc(x_ref, wug_ref, wd_ref, o_ref, acc_ref, *, ht):
    """Low-precision-output path: f32 VMEM accumulator, cast in the epilogue."""
    h = pl.program_id(1)

    @pl.when(h == 0)
    def _init():
        acc_ref[...] = jnp.zeros_like(acc_ref)

    x = x_ref[...]
    ug = jnp.dot(x, wug_ref[...], preferred_element_type=jnp.float32)
    up = ug[:, :ht]
    gate = ug[:, ht:]
    hidden = (up * jax.nn.sigmoid(up)) * gate
    acc_ref[...] += jnp.dot(hidden.astype(wd_ref.dtype), wd_ref[...],
                            preferred_element_type=jnp.float32)

    @pl.when(h == pl.num_programs(1) - 1)
    def _finalize():
        o_ref[...] = acc_ref[...].astype(o_ref.dtype)


@functools.partial(jax.jit, static_argnames=("tm", "hidden_tile", "compute_dtype"))
def swiglu_ffn(x, w_up, w_gate, w_down, *, tm=256, hidden_tile=512,
               compute_dtype=jnp.bfloat16):
    """x: [B, S, dim]; w_up/w_gate: [dim, hidden]; w_down: [hidden, dim].

    Defaults target v6e/v7x (256x256 MXU, 64 MiB VMEM on v7x); both tiles are
    multiples of 128 so v5e's 128x128 MXU is saturated as well.
    """
    B, S, dim = x.shape
    hidden = w_up.shape[1]
    M = B * S

    tm = min(tm, M)
    if M % tm != 0:
        tm = M
    hidden_tile = min(hidden_tile, hidden)
    if hidden % hidden_tile != 0:
        hidden_tile = hidden
    n_m = M // tm
    n_h = hidden // hidden_tile

    out_dtype = x.dtype
    # bf16 operands for the MXU; accumulation stays f32.
    x2d = x.reshape(M, dim).astype(compute_dtype)
    w_up_c = w_up.astype(compute_dtype)
    w_gate_c = w_gate.astype(compute_dtype)
    w_down_c = w_down.astype(compute_dtype)

    # Interleave up/gate per hidden tile so tile h of w_ug is [up_h | gate_h]
    # and a single dot per grid step produces both projections.
    w_ug = jnp.concatenate(
        [w_up_c.reshape(dim, n_h, hidden_tile),
         w_gate_c.reshape(dim, n_h, hidden_tile)],
        axis=2).reshape(dim, 2 * hidden)

    itemsize = jnp.dtype(compute_dtype).itemsize
    cost = pl.CostEstimate(
        flops=6 * M * dim * hidden,
        transcendentals=M * hidden,
        bytes_accessed=(M * dim * itemsize            # x
                        + 3 * dim * hidden * itemsize  # w_up, w_gate, w_down
                        + M * dim * jnp.dtype(out_dtype).itemsize))

    direct = (out_dtype == jnp.float32)
    if direct:
        kernel = functools.partial(_swiglu_kernel_direct, ht=hidden_tile)
        scratch = []
    else:
        kernel = functools.partial(_swiglu_kernel_acc, ht=hidden_tile)
        scratch = [pltpu.VMEM((tm, dim), jnp.float32)]

    out2d = pl.pallas_call(
        kernel,
        out_shape=jax.ShapeDtypeStruct((M, dim), out_dtype),
        grid_spec=pltpu.PrefetchScalarGridSpec(
            num_scalar_prefetch=0,
            grid=(n_m, n_h),                      # reduction (hidden) axis last
            in_specs=[
                pl.BlockSpec((tm, dim), lambda i, h: (i, 0)),              # x
                pl.BlockSpec((dim, 2 * hidden_tile), lambda i, h: (0, h)),  # up|gate
                pl.BlockSpec((hidden_tile, dim), lambda i, h: (h, 0)),      # down
            ],
            out_specs=pl.BlockSpec((tm, dim), lambda i, h: (i, 0)),
            scratch_shapes=scratch,
        ),
        compiler_params=pltpu.CompilerParams(
            # token tiles shard across v7x's 2 TensorCores; hidden is a reduction
            dimension_semantics=("parallel", "arbitrary"),
            vmem_limit_bytes=48 * 1024 * 1024,   # fits v7x 64 MiB / v5e-v6e 128 MiB
        ),
        cost_estimate=cost,
    )(x2d, w_ug, w_down_c)

    return out2d.reshape(B, S, dim)


# ---------------------------------------------------------------------------
# Full decoder layer
# ---------------------------------------------------------------------------
def custom_decoder_layer(x, params, *, n_heads, attn_mask=None,
                         key_padding_mask=None, is_causal=False, eps=1e-6,
                         ffn_tm=256, ffn_hidden_tile=512,
                         ffn_compute_dtype=jnp.bfloat16):
    res = x
    h = rmsnorm(x, params["norm1_w"], eps=eps)
    attn = multihead_self_attention(
        h, params["in_proj_w"], params["in_proj_b"],
        params["out_proj_w"], params["out_proj_b"], n_heads,
        attn_mask=attn_mask, key_padding_mask=key_padding_mask,
        is_causal=is_causal)
    x = res + attn
    res = x
    h = rmsnorm(x, params["norm2_w"], eps=eps)
    ffn = swiglu_ffn(h, params["w_up"], params["w_gate"], params["w_down"],
                     tm=ffn_tm, hidden_tile=ffn_hidden_tile,
                     compute_dtype=ffn_compute_dtype)
    return res + ffn


# ---------------------------------------------------------------------------
# Pure-JAX references (for validation)
# ---------------------------------------------------------------------------
def rmsnorm_ref(x, weight, eps=1e-6):
    xf = x.astype(jnp.float32)
    normed = xf * jax.lax.rsqrt(jnp.mean(xf * xf, axis=-1, keepdims=True) + eps)
    return (normed * weight.astype(jnp.float32)).astype(x.dtype)


def mha_ref(x, in_proj_w, in_proj_b, out_proj_w, out_proj_b, n_heads, bias):
    B, S, E = x.shape
    H = n_heads
    Dh = E // H
    qkv = jnp.einsum("bse,ef->bsf", x, in_proj_w, precision="highest") + in_proj_b
    qkv = qkv.reshape(B, S, 3, H, Dh)
    q = jnp.transpose(qkv[:, :, 0], (0, 2, 1, 3))
    k = jnp.transpose(qkv[:, :, 1], (0, 2, 1, 3))
    v = jnp.transpose(qkv[:, :, 2], (0, 2, 1, 3))
    s = jnp.einsum("bhqd,bhkd->bhqk", q, k, precision="highest") * (1.0 / math.sqrt(Dh))
    s = s + bias[:, None, :, :]
    p = jax.nn.softmax(s, axis=-1)
    ctx = jnp.einsum("bhqk,bhkd->bhqd", p, v, precision="highest")
    ctx = jnp.transpose(ctx, (0, 2, 1, 3)).reshape(B, S, E)
    out = jnp.einsum("bse,ef->bsf", ctx, out_proj_w, precision="highest") + out_proj_b
    return out.astype(x.dtype)


def swiglu_ref(x, w_up, w_gate, w_down, compute_dtype=jnp.bfloat16):
    cd = compute_dtype
    xb = x.astype(cd)
    up = jnp.einsum("bsd,dh->bsh", xb, w_up.astype(cd),
                    preferred_element_type=jnp.float32)
    gate = jnp.einsum("bsd,dh->bsh", xb, w_gate.astype(cd),
                      preferred_element_type=jnp.float32)
    h = (up * jax.nn.sigmoid(up)) * gate
    y = jnp.einsum("bsh,hd->bsd", h.astype(cd), w_down.astype(cd),
                   preferred_element_type=jnp.float32)
    return y.astype(x.dtype)


def decoder_layer_ref(x, params, *, n_heads, attn_mask=None,
                      key_padding_mask=None, is_causal=False, eps=1e-6,
                      ffn_compute_dtype=jnp.bfloat16):
    B, S, _ = x.shape
    bias = _build_attn_bias(attn_mask, key_padding_mask, is_causal, B, S)
    res = x
    h = rmsnorm_ref(x, params["norm1_w"], eps)
    x = res + mha_ref(h, params["in_proj_w"], params["in_proj_b"],
                      params["out_proj_w"], params["out_proj_b"], n_heads, bias)
    res = x
    h = rmsnorm_ref(x, params["norm2_w"], eps)
    return res + swiglu_ref(h, params["w_up"], params["w_gate"],
                            params["w_down"], compute_dtype=ffn_compute_dtype)


# ---------------------------------------------------------------------------
if __name__ == "__main__":
    # Small shapes consistent with the module; d_model kept a multiple of 128
    # so output stores are lane-dense.
    B, S, d_model, n_heads, d_ffn = 2, 8, 128, 4, 256

    key = jax.random.PRNGKey(0)
    ks = jax.random.split(key, 10)
    x = jax.random.normal(ks[0], (B, S, d_model), dtype=jnp.float32)

    params = {
        "norm1_w": 1.0 + 0.1 * jax.random.normal(ks[1], (d_model,), jnp.float32),
        "norm2_w": 1.0 + 0.1 * jax.random.normal(ks[2], (d_model,), jnp.float32),
        "in_proj_w": jax.random.normal(ks[3], (d_model, 3 * d_model), jnp.float32) * d_model ** -0.5,
        "in_proj_b": 0.02 * jax.random.normal(ks[4], (3 * d_model,), jnp.float32),
        "out_proj_w": jax.random.normal(ks[5], (d_model, d_model), jnp.float32) * d_model ** -0.5,
        "out_proj_b": 0.02 * jax.random.normal(ks[6], (d_model,), jnp.float32),
        "w_up": jax.random.normal(ks[7], (d_model, d_ffn), jnp.float32) * d_model ** -0.5,
        "w_gate": jax.random.normal(ks[8], (d_model, d_ffn), jnp.float32) * d_model ** -0.5,
        "w_down": jax.random.normal(ks[9], (d_ffn, d_model), jnp.float32) * d_ffn ** -0.5,
    }

    # key_padding_mask: ignore the last key position of batch 1.
    key_padding_mask = jnp.zeros((B, S), dtype=bool).at[1, S - 1].set(True)

    # Full decoder layer (causal self-attention, f32 activations). Small FFN
    # tiles force a real multi-step (token x hidden) grid on the toy shapes.
    y = custom_decoder_layer(
        x, params, n_heads=n_heads, attn_mask=None,
        key_padding_mask=key_padding_mask, is_causal=True,
        ffn_tm=8, ffn_hidden_tile=128)
    jax.block_until_ready(y)

    y_ref = decoder_layer_ref(
        x, params, n_heads=n_heads, attn_mask=None,
        key_padding_mask=key_padding_mask, is_causal=True)
    assert y.shape == (B, S, d_model)
    # Tolerance is loose because the FFN feeds the MXU bf16 operands.
    assert jnp.allclose(y, y_ref, atol=5e-2, rtol=5e-2), float(
        jnp.max(jnp.abs(y - y_ref)))

    # Unit check of the FFN kernel's bf16-output path (f32 scratch accumulator)
    # with a multi-tile grid, against a matched-precision reference.
    xb = x.astype(jnp.bfloat16)
    yf = swiglu_ffn(xb, params["w_up"], params["w_gate"], params["w_down"],
                    tm=8, hidden_tile=128)
    jax.block_until_ready(yf)
    yf_ref = swiglu_ref(xb, params["w_up"], params["w_gate"], params["w_down"])
    assert jnp.allclose(yf.astype(jnp.float32), yf_ref.astype(jnp.float32),
                        atol=3e-2, rtol=3e-2)

    print("KERNEL_OK")
</pallas_src>

<mosaic_0001>
module attributes {stable_mosaic.version = 11 : i64} {
  func.func @_rmsnorm_kernel(%arg0: i32, %arg1: memref<16x128xf32, #tpu.memory_space<vmem>>, %arg2: memref<1x128xf32, #tpu.memory_space<vmem>>, %arg3: memref<16x128xf32, #tpu.memory_space<vmem>>) attributes {dimension_semantics = [#tpu.dimension_semantics<parallel>], iteration_bounds = array<i64: 1>, scalar_prefetch = 0 : i64, scratch_operands = 0 : i64, tpu.core_type = #tpu.core_type<tc>, window_params = [{transform_indices = @transform_0, window_bounds = array<i64: 16, 128>}, {pipeline_mode = #tpu.pipeline_mode<synchronous>, transform_indices = @transform_1, window_bounds = array<i64: 1, 128>}, {transform_indices = @transform_2, window_bounds = array<i64: 16, 128>}]} {
    %c0 = arith.constant 0 : index
    %c0_0 = arith.constant 0 : index
    %0 = vector.load %arg1[%c0, %c0_0] : memref<16x128xf32, #tpu.memory_space<vmem>>, vector<16x128xf32>
    %1 = arith.mulf %0, %0 : vector<16x128xf32>
    %cst = arith.constant dense<0.000000e+00> : vector<16xf32>
    %2 = vector.multi_reduction <add>, %1, %cst [1] : vector<16x128xf32> to vector<16xf32>
    %3 = vector.shape_cast %2 : vector<16xf32> to vector<16x1xf32>
    %cst_1 = arith.constant 1.280000e+02 : f32
    %4 = vector.broadcast %cst_1 : f32 to vector<16x1xf32>
    %5 = arith.divf %3, %4 : vector<16x1xf32>
    %cst_2 = arith.constant 9.99999997E-7 : f32
    %6 = vector.broadcast %cst_2 : f32 to vector<16x1xf32>
    %7 = arith.addf %5, %6 : vector<16x1xf32>
    %8 = math.rsqrt %7 : vector<16x1xf32>
    %9 = vector.broadcast %8 : vector<16x1xf32> to vector<16x128xf32>
    %10 = arith.mulf %0, %9 : vector<16x128xf32>
    %c0_3 = arith.constant 0 : index
    %c0_4 = arith.constant 0 : index
    %11 = vector.load %arg2[%c0_3, %c0_4] : memref<1x128xf32, #tpu.memory_space<vmem>>, vector<1x128xf32>
    %12 = vector.broadcast %11 : vector<1x128xf32> to vector<16x128xf32>
    %13 = arith.mulf %10, %12 : vector<16x128xf32>
    %c0_5 = arith.constant 0 : index
    %c0_6 = arith.constant 0 : index
    %14 = vector.load %arg3[%c0_5, %c0_6] : memref<16x128xf32, #tpu.memory_space<vmem>>, vector<16x128xf32>
    tpu.vector_store %arg3[%c0_5, %c0_6], %13 {strides = array<i32>} : memref<16x128xf32, #tpu.memory_space<vmem>>, vector<16x128xf32>,
    return
  }
  func.func @transform_0(%arg0: i32) -> (i32, i32) {
    %c0_i32 = arith.constant 0 : i32
    %c0_i32_0 = arith.constant 0 : i32
    return %arg0, %c0_i32 : i32, i32
  }
  func.func @transform_1(%arg0: i32) -> (i32, i32) {
    %c0_i32 = arith.constant 0 : i32
    %c0_i32_0 = arith.constant 0 : i32
    %c0_i32_1 = arith.constant 0 : i32
    return %c0_i32, %c0_i32_0 : i32, i32
  }
  func.func @transform_2(%arg0: i32) -> (i32, i32) {
    %c0_i32 = arith.constant 0 : i32
    %c0_i32_0 = arith.constant 0 : i32
    return %arg0, %c0_i32 : i32, i32
  }
}

</mosaic_0001>

<bundles_post_ra>
// kernel: tpu_custom_call.1
= control target key start
LH: loop header
LB: loop body
LE: loop exit
PB: predicated region body
PF: predicated region fallthrough
CT: control target
= control target key end

     0   :  { %7 = vsyncpa [#allocation3], 0  ;;  %s180_s0 = inlined_call_operand.hbm [shape: f32[16,128], index: 0, kind: input, shape index: {}]   ;;  %s181_s1 = inlined_call_operand.vmem [shape: f32[1,128], index: 1, kind: input, shape index: {}]   ;;  %s182_s2 = inlined_call_operand.hbm [shape: f32[16,128], index: 2, kind: output, shape index: {}]  }
   0x1   :  { %8 = vsyncpa [#allocation4], 0  ;;  %s128_s9 = smov [#allocation2]   ;;  %s80_s13 = scalar_lea.hbm %s180_s0, 256 }
   0x2   :  { %s14_s10 = sshll.u32 %s128_s9, 4  ;;  %p81_p0 = scmp.ne.s32.totalorder %s180_s0, %s80_s13  ;;  %s15_s10 = int_to_ptr.vmem [resolvable:$true] %s14_s10 }
   0x3   :  { %p84_p1 = scmp.lt.u32.totalorder %s80_s13, %s180_s0 }
   0x5   :  { %p86_p2 = pnand %p84_p1, %p81_p0 }
   0x7   :  { %89 = shalt.err (!%p86_p2)
}
   0x8   :  { %s90_s18 = scalar_lea.vmem %s15_s10, 256  ;;  %p95_p4 = scmp.lt.s32.totalorder %s15_s10, %s15_s10 }
   0x9   :  { %p91_p3 = scmp.ne.s32.totalorder %s15_s10, %s90_s18  ;;  %p96_p5 = scmp.lt.s32.totalorder %s90_s18, %s90_s18 }
   0xb   :  { %p97_p6 = por %p96_p5, %p95_p4 }
   0xd   :  { %p98_p7 = pnand %p97_p6, %p91_p3 }
   0xf   :  { %101 = shalt.err (!%p98_p7)
}
  0x10   :  { %s129_s19 = smov 128   ;;  %s130_s20 = smov 8  }
  0x11   :  { %20 = dma.hbm_to_vmem [thread:$0]  %s180_s0, 256, %s15_s10, [#allocation3], %s129_s19, %s129_s19, %s130_s20  }
  0x12   :  { %124 = dma.done.wait [#allocation3], 256  }
  0x13   :  { %125 = vsyncadd [#allocation3], 4294967040  ;;  %v26_v0 = vld [vmem:[#allocation2] sm:$0xff]  ;;  %v27_v1 = vld [vmem:[#allocation2 + $0x8] sm:$0xff]  ;;  %s131_s0 = smov [#allocation5]  }
  0x14   :  { %v28_v2 = vmul.f32 %v26_v0, %v26_v0  ;;  %v29_v3 = vmul.f32 %v27_v1, %v27_v1  ;;  %v71_v11 = vld [vmem:[%s181_s1] ss:$0 sm:$0xff]  ;;  %s59_s25 = sshll.u32 %s131_s0, 4  ;;  %s60_s25 = int_to_ptr.vmem [resolvable:$true] %s59_s25 }
  0x15   :  { %s102_s26 = scalar_lea.vmem %s60_s25, 256  ;;  %p107_p9 = scmp.lt.s32.totalorder %s60_s25, %s60_s25 }
  0x16   :  { %30 = vadd.xlane.f32.xlu0 %v28_v2  ;;  %p103_p8 = scmp.ne.s32.totalorder %s60_s25, %s102_s26  ;;  %p108_p10 = scmp.lt.s32.totalorder %s102_s26, %s102_s26 }
  0x18   :  { %p109_p11 = por %p108_p10, %p107_p9 }
  0x1a   :  { %32 = vadd.xlane.f32.xlu0 %v29_v3  ;;  %p110_p12 = pnand %p109_p11, %p103_p8 }
  0xa3   :  { %v31_v4 = vpop.xlane.xlu0 %30 }
  0xa4   :  { %v35_v5 = vmul.f32 0.0078125, %v31_v4 }
  0xa6   :  { %v37_v6 = vadd.f32 1e-06, %v35_v5 }
  0xa7   :  { %v33_v7 = vpop.xlane.xlu0 %32 }
  0xa8   :  { %76 = vrsqrt.f32 %v37_v6  ;;  %v36_v8 = vmul.f32 0.0078125, %v33_v7 }
  0xaa   :  { %v38_v9 = vadd.f32 1e-06, %v36_v8 }
  0xac   :  { %78 = vrsqrt.f32 %v38_v9 }
  0xb2   :  { %v77_v10 = vpop.eup %76 }
  0xb3   :  { %v41_v12 = vmul.f32 %v77_v10, %v26_v0 }
  0xb5   :  { %v50_v13 = vmul.f32 %v71_v11, %v41_v12 }
  0xb6   :  { %v79_v14 = vpop.eup %78 }
  0xb7   :  { %v42_v15 = vmul.f32 %v79_v14, %v27_v1  ;;  %52 = vst [vmem:[#allocation5] sm:$0xff] %v50_v13 }
  0xb9   :  { %v51_v16 = vmul.f32 %v71_v11, %v42_v15 }
  0xbb   :  { %53 = vst [vmem:[#allocation5 + $0x8] sm:$0xff] %v51_v16 }
  0xbc   :  { %113 = shalt.err (!%p110_p12)
}
  0xbd   :  { %s114_s1 = scalar_lea.hbm %s182_s2, 256 }
  0xbe   :  { %p115_p13 = scmp.ne.s32.totalorder %s182_s2, %s114_s1  ;;  %p118_p0 = scmp.lt.u32.totalorder %s114_s1, %s182_s2 }
  0xc0   :  { %p120_p1 = pnand %p118_p0, %p115_p13 }
  0xc2   :  { %123 = shalt.err (!%p120_p1)
}
  0xc3   :  { %65 = dma.vmem_to_hbm [thread:$0]  %s60_s25, 256, %s182_s2, [#allocation4], %s129_s19, %s129_s19, %s130_s20  }
  0xc4   :  { %126 = dma.done.wait [#allocation4], 256  }
  0xc5   :  { %127 = vsyncadd [#allocation4], 4294967040 }
  0xc6   :  { %69 = vsyncpa [#allocation3], 1 }
  0xc7   :  { %70 = vsyncpa [#allocation4], 1 }

</bundles_post_ra>
